<compile_context>
chip_gen: v6e
topology: v6e:2x2x1
jax: 0.10.0
libtpu: 0.0.40
codegen_flags: <defaults>
</compile_context>

<pallas_src>
import jax
import jax.numpy as jnp
from jax.experimental import pallas as pl
from jax.experimental.pallas import tpu as pltpu


def _round_up(x, m):
    return (x + m - 1) // m * m


def grade_fc_kernel(x_ref,
                    w1_ref, b1_ref,
                    w2_ref, b2_ref,
                    w3_ref, b3_ref,
                    w4_ref, b4_ref,
                    o_ref):
    """Activations are (features, batch): the batch maps to lanes (lane-dense)."""
    cdt = w1_ref.dtype  # MXU compute dtype (bfloat16)

    # fc1 + relu: (64, N_in) @ (N_in, TB) -> (64, TB), f32 accumulation.
    a = jnp.dot(w1_ref[...], x_ref[...], preferred_element_type=jnp.float32)
    h = jnp.maximum(a + b1_ref[...], 0.0)

    # fc2 + relu: (128, 64) @ (64, TB) -> (128, TB).
    a = jnp.dot(w2_ref[...], h.astype(cdt), preferred_element_type=jnp.float32)
    h = jnp.maximum(a + b2_ref[...], 0.0)

    # fc3 + relu: (256, 128) @ (128, TB) -> (256, TB).
    a = jnp.dot(w3_ref[...], h.astype(cdt), preferred_element_type=jnp.float32)
    h = jnp.maximum(a + b3_ref[...], 0.0)

    # fcout (252 -> 1) as a VPU multiply + sublane reduction (no 1-column MXU
    # matmul); the result is already lane-dense with shape (1, TB).
    z = jnp.sum(h * w4_ref[...], axis=0, keepdims=True) + b4_ref[...]
    o_ref[...] = (jax.nn.sigmoid(z) * 10.0).astype(o_ref.dtype)


def grade_fc_forward(x, kparams, *, block_b=512):
    """x: (B, N_in) float32. kparams: padded kernel params from prepare_params.

    Returns (B, 1) float32, matching the PyTorch module's forward.
    """
    B, n_in = x.shape
    compute_dtype = kparams["w1"].dtype

    # Batch tile: lane-dense multiple of 128, capped by the (padded) batch size.
    tile_b = min(_round_up(block_b, 128), _round_up(B, 128))
    b_pad = _round_up(B, tile_b)
    grid = (b_pad // tile_b,)

    # Lane-major activation stream (N_in, B_pad); padded columns are zero.
    # Pure layout plumbing in the wrapper.
    xt = jnp.zeros((n_in, b_pad), compute_dtype).at[:, :B].set(
        x.T.astype(compute_dtype))

    def resident(shape):
        # Weights/biases: single block, stays VMEM-resident across grid steps.
        return pl.BlockSpec(shape, lambda i: (0, 0))

    out = pl.pallas_call(
        grade_fc_kernel,
        out_shape=jax.ShapeDtypeStruct((1, b_pad), jnp.float32),
        grid=grid,
        in_specs=[
            pl.BlockSpec((n_in, tile_b), lambda i: (0, i)),   # activation stream
            resident(kparams["w1"].shape), resident(kparams["b1"].shape),
            resident(kparams["w2"].shape), resident(kparams["b2"].shape),
            resident(kparams["w3"].shape), resident(kparams["b3"].shape),
            resident(kparams["w4"].shape), resident(kparams["b4"].shape),
        ],
        out_specs=pl.BlockSpec((1, tile_b), lambda i: (0, i)),
        compiler_params=pltpu.CompilerParams(
            dimension_semantics=("parallel",),       # megacore sharding on v7x
            vmem_limit_bytes=32 * 1024 * 1024,       # explicit budget (v7x-safe)
        ),
    )(xt,
      kparams["w1"], kparams["b1"],
      kparams["w2"], kparams["b2"],
      kparams["w3"], kparams["b3"],
      kparams["w4"], kparams["b4"])

    return out[0, :B].reshape(B, 1)


def init_params(key, n_in):
    """f32 master params in PyTorch nn.Linear layout: w (out, in), b (out,),
    with U(-1/sqrt(fan_in), 1/sqrt(fan_in)) init."""
    dims = [(n_in, 64), (64, 126), (126, 252), (252, 1)]
    params = {}
    for idx, (fin, fout) in enumerate(dims, start=1):
        key, kw, kb = jax.random.split(key, 3)
        bound = 1.0 / jnp.sqrt(jnp.float32(fin))
        params[f"w{idx}"] = jax.random.uniform(
            kw, (fout, fin), jnp.float32, minval=-bound, maxval=bound)
        params[f"b{idx}"] = jax.random.uniform(
            kb, (fout,), jnp.float32, minval=-bound, maxval=bound)
    return params


def prepare_params(params, compute_dtype=jnp.bfloat16):
    """Zero-pad hidden widths 126->128 and 252->256 (bit-identical through ReLU:
    padded weight rows/cols and bias entries are zero) and cast the MXU-side
    weights to the compute dtype. Biases stay f32 as (out, 1) columns; the fcout
    weight becomes an f32 (256, 1) column used on the VPU."""
    n_in = params["w1"].shape[1]

    def pad_to(w, rows, cols):
        return jnp.zeros((rows, cols), w.dtype).at[:w.shape[0], :w.shape[1]].set(w)

    def pad_bias(b, rows):
        return jnp.zeros((rows, 1), b.dtype).at[:b.shape[0], 0].set(b)

    return {
        "w1": pad_to(params["w1"], 64, n_in).astype(compute_dtype),
        "b1": pad_bias(params["b1"], 64),
        "w2": pad_to(params["w2"], 128, 64).astype(compute_dtype),
        "b2": pad_bias(params["b2"], 128),
        "w3": pad_to(params["w3"], 256, 128).astype(compute_dtype),
        "b3": pad_bias(params["b3"], 256),
        "w4": pad_to(params["w4"], 1, 256).T.astype(jnp.float32),
        "b4": params["b4"].reshape(1, 1).astype(jnp.float32),
    }


def reference_forward(x, params, compute_dtype=jnp.bfloat16):
    """Plain-JAX reference mirroring the kernel's precision (bf16 matmul inputs,
    f32 accumulation / elementwise), written in the standard (batch, feature)
    layout with the unpadded PyTorch-layout params."""
    def mm(h, w):
        return jnp.dot(h.astype(compute_dtype), w.T.astype(compute_dtype),
                       preferred_element_type=jnp.float32)
    h = jnp.maximum(mm(x, params["w1"]) + params["b1"], 0.0)
    h = jnp.maximum(mm(h, params["w2"]) + params["b2"], 0.0)
    h = jnp.maximum(mm(h, params["w3"]) + params["b3"], 0.0)
    z = jnp.sum(h * params["w4"], axis=-1, keepdims=True) + params["b4"]
    return jax.nn.sigmoid(z) * 10.0


def reference_forward_f32(x, params):
    """Full-f32 reference of the original PyTorch forward (semantic sanity)."""
    h = jnp.maximum(x @ params["w1"].T + params["b1"], 0.0)
    h = jnp.maximum(h @ params["w2"].T + params["b2"], 0.0)
    h = jnp.maximum(h @ params["w3"].T + params["b3"], 0.0)
    z = h @ params["w4"].T + params["b4"]
    return jax.nn.sigmoid(z) * 10.0


if __name__ == "__main__":
    key = jax.random.PRNGKey(0)
    key, kx = jax.random.split(key)

    B, N_in = 8, 32
    x = jax.random.normal(kx, (B, N_in), jnp.float32)
    params = init_params(key, N_in)
    kparams = prepare_params(params)

    out = jax.block_until_ready(grade_fc_forward(x, kparams))
    assert out.shape == (B, 1)

    ref = reference_forward(x, params)
    assert jnp.allclose(out, ref, atol=1e-3, rtol=1e-3), \
        float(jnp.max(jnp.abs(out - ref)))
    ref32 = reference_forward_f32(x, params)
    assert jnp.allclose(out, ref32, atol=0.3), \
        float(jnp.max(jnp.abs(out - ref32)))

    # Exercise a multi-step batch grid (2 tiles of 512 rows).
    key, kx2 = jax.random.split(key)
    B2 = 1024
    x2 = jax.random.normal(kx2, (B2, N_in), jnp.float32)
    out2 = jax.block_until_ready(grade_fc_forward(x2, kparams, block_b=512))
    assert out2.shape == (B2, 1)
    ref2 = reference_forward(x2, params)
    assert jnp.allclose(out2, ref2, atol=1e-3, rtol=1e-3), \
        float(jnp.max(jnp.abs(out2 - ref2)))

    print("KERNEL_OK")
</pallas_src>

<mosaic_0001>
module attributes {stable_mosaic.version = 11 : i64} {
  func.func @grade_fc_kernel(%arg0: i32, %arg1: memref<32x128xbf16, #tpu.memory_space<vmem>>, %arg2: memref<64x32xbf16, #tpu.memory_space<vmem>>, %arg3: memref<64x1xf32, #tpu.memory_space<vmem>>, %arg4: memref<128x64xbf16, #tpu.memory_space<vmem>>, %arg5: memref<128x1xf32, #tpu.memory_space<vmem>>, %arg6: memref<256x128xbf16, #tpu.memory_space<vmem>>, %arg7: memref<256x1xf32, #tpu.memory_space<vmem>>, %arg8: memref<256x1xf32, #tpu.memory_space<vmem>>, %arg9: memref<1x1xf32, #tpu.memory_space<vmem>>, %arg10: memref<1x128xf32, #tpu.memory_space<vmem>>) attributes {dimension_semantics = [#tpu.dimension_semantics<parallel>], iteration_bounds = array<i64: 1>, scalar_prefetch = 0 : i64, scratch_operands = 0 : i64, tpu.core_type = #tpu.core_type<tc>, window_params = [{transform_indices = @transform_0, window_bounds = array<i64: 32, 128>}, {pipeline_mode = #tpu.pipeline_mode<synchronous>, transform_indices = @transform_1, window_bounds = array<i64: 64, 32>}, {pipeline_mode = #tpu.pipeline_mode<synchronous>, transform_indices = @transform_2, window_bounds = array<i64: 64, 1>}, {pipeline_mode = #tpu.pipeline_mode<synchronous>, transform_indices = @transform_3, window_bounds = array<i64: 128, 64>}, {pipeline_mode = #tpu.pipeline_mode<synchronous>, transform_indices = @transform_4, window_bounds = array<i64: 128, 1>}, {pipeline_mode = #tpu.pipeline_mode<synchronous>, transform_indices = @transform_5, window_bounds = array<i64: 256, 128>}, {pipeline_mode = #tpu.pipeline_mode<synchronous>, transform_indices = @transform_6, window_bounds = array<i64: 256, 1>}, {pipeline_mode = #tpu.pipeline_mode<synchronous>, transform_indices = @transform_7, window_bounds = array<i64: 256, 1>}, {pipeline_mode = #tpu.pipeline_mode<synchronous>, transform_indices = @transform_8, window_bounds = array<i64: 1, 1>}, {transform_indices = @transform_9, window_bounds = array<i64: 1, 128>}]} {
    %c0 = arith.constant 0 : index
    %c0_0 = arith.constant 0 : index
    %0 = vector.load %arg2[%c0, %c0_0] : memref<64x32xbf16, #tpu.memory_space<vmem>>, vector<64x32xbf16>
    %c0_1 = arith.constant 0 : index
    %c0_2 = arith.constant 0 : index
    %1 = vector.load %arg1[%c0_1, %c0_2] : memref<32x128xbf16, #tpu.memory_space<vmem>>, vector<32x128xbf16>
    %cst = arith.constant dense<0.000000e+00> : vector<64x128xf32>
    %2 = tpu.matmul %0, %1, %cst {dimension_numbers = #tpu.dot_dimension_numbers<[1], [0], [0], [1], [0, 0, 1, 1], [], []>} : vector<64x32xbf16>, vector<32x128xbf16>, vector<64x128xf32> -> vector<64x128xf32>
    %c0_3 = arith.constant 0 : index
    %c0_4 = arith.constant 0 : index
    %3 = vector.load %arg3[%c0_3, %c0_4] : memref<64x1xf32, #tpu.memory_space<vmem>>, vector<64x1xf32>
    %4 = vector.broadcast %3 : vector<64x1xf32> to vector<64x128xf32>
    %5 = arith.addf %2, %4 : vector<64x128xf32>
    %cst_5 = arith.constant 0.000000e+00 : f32
    %6 = vector.broadcast %cst_5 : f32 to vector<64x128xf32>
    %7 = arith.maximumf %5, %6 : vector<64x128xf32>
    %c0_6 = arith.constant 0 : index
    %c0_7 = arith.constant 0 : index
    %8 = vector.load %arg4[%c0_6, %c0_7] : memref<128x64xbf16, #tpu.memory_space<vmem>>, vector<128x64xbf16>
    %9 = arith.truncf %7 : vector<64x128xf32> to vector<64x128xbf16>
    %cst_8 = arith.constant dense<0.000000e+00> : vector<128x128xf32>
    %10 = tpu.matmul %8, %9, %cst_8 {dimension_numbers = #tpu.dot_dimension_numbers<[1], [0], [0], [1], [0, 0, 1, 1], [], []>} : vector<128x64xbf16>, vector<64x128xbf16>, vector<128x128xf32> -> vector<128x128xf32>
    %c0_9 = arith.constant 0 : index
    %c0_10 = arith.constant 0 : index
    %11 = vector.load %arg5[%c0_9, %c0_10] : memref<128x1xf32, #tpu.memory_space<vmem>>, vector<128x1xf32>
    %12 = vector.broadcast %11 : vector<128x1xf32> to vector<128x128xf32>
    %13 = arith.addf %10, %12 : vector<128x128xf32>
    %cst_11 = arith.constant 0.000000e+00 : f32
    %14 = vector.broadcast %cst_11 : f32 to vector<128x128xf32>
    %15 = arith.maximumf %13, %14 : vector<128x128xf32>
    %c0_12 = arith.constant 0 : index
    %c0_13 = arith.constant 0 : index
    %16 = vector.load %arg6[%c0_12, %c0_13] : memref<256x128xbf16, #tpu.memory_space<vmem>>, vector<256x128xbf16>
    %17 = arith.truncf %15 : vector<128x128xf32> to vector<128x128xbf16>
    %cst_14 = arith.constant dense<0.000000e+00> : vector<256x128xf32>
    %18 = tpu.matmul %16, %17, %cst_14 {dimension_numbers = #tpu.dot_dimension_numbers<[1], [0], [0], [1], [0, 0, 1, 1], [], []>} : vector<256x128xbf16>, vector<128x128xbf16>, vector<256x128xf32> -> vector<256x128xf32>
    %c0_15 = arith.constant 0 : index
    %c0_16 = arith.constant 0 : index
    %19 = vector.load %arg7[%c0_15, %c0_16] : memref<256x1xf32, #tpu.memory_space<vmem>>, vector<256x1xf32>
    %20 = vector.broadcast %19 : vector<256x1xf32> to vector<256x128xf32>
    %21 = arith.addf %18, %20 : vector<256x128xf32>
    %cst_17 = arith.constant 0.000000e+00 : f32
    %22 = vector.broadcast %cst_17 : f32 to vector<256x128xf32>
    %23 = arith.maximumf %21, %22 : vector<256x128xf32>
    %c0_18 = arith.constant 0 : index
    %c0_19 = arith.constant 0 : index
    %24 = vector.load %arg8[%c0_18, %c0_19] : memref<256x1xf32, #tpu.memory_space<vmem>>, vector<256x1xf32>
    %25 = vector.broadcast %24 : vector<256x1xf32> to vector<256x128xf32>
    %26 = arith.mulf %23, %25 : vector<256x128xf32>
    %cst_20 = arith.constant dense<0.000000e+00> : vector<128xf32>
    %27 = vector.multi_reduction <add>, %26, %cst_20 [0] : vector<256x128xf32> to vector<128xf32>
    %28 = vector.shape_cast %27 : vector<128xf32> to vector<1x128xf32>
    %c0_21 = arith.constant 0 : index
    %c0_22 = arith.constant 0 : index
    %29 = vector.load %arg9[%c0_21, %c0_22] : memref<1x1xf32, #tpu.memory_space<vmem>>, vector<1x1xf32>
    %30 = vector.broadcast %29 : vector<1x1xf32> to vector<1x128xf32>
    %31 = arith.addf %28, %30 : vector<1x128xf32>
    %32 = arith.negf %31 : vector<1x128xf32>
    %33 = math.exp %32 : vector<1x128xf32>
    %cst_23 = arith.constant 1.000000e+00 : f32
    %34 = vector.broadcast %cst_23 : f32 to vector<1x128xf32>
    %35 = arith.addf %34, %33 : vector<1x128xf32>
    %36 = arith.divf %34, %35 : vector<1x128xf32>
    %cst_24 = arith.constant 1.000000e+01 : f32
    %37 = vector.broadcast %cst_24 : f32 to vector<1x128xf32>
    %38 = arith.mulf %36, %37 : vector<1x128xf32>
    %c0_25 = arith.constant 0 : index
    %c0_26 = arith.constant 0 : index
    %39 = vector.load %arg10[%c0_25, %c0_26] : memref<1x128xf32, #tpu.memory_space<vmem>>, vector<1x128xf32>
    tpu.vector_store %arg10[%c0_25, %c0_26], %38 {strides = array<i32>} : memref<1x128xf32, #tpu.memory_space<vmem>>, vector<1x128xf32>,
    return
  }
  func.func @transform_0(%arg0: i32) -> (i32, i32) {
    %c0_i32 = arith.constant 0 : i32
    %c0_i32_0 = arith.constant 0 : i32
    return %c0_i32, %arg0 : i32, i32
  }
  func.func @transform_1(%arg0: i32) -> (i32, i32) {
    %c0_i32 = arith.constant 0 : i32
    %c0_i32_0 = arith.constant 0 : i32
    %c0_i32_1 = arith.constant 0 : i32
    return %c0_i32, %c0_i32_0 : i32, i32
  }
  func.func @transform_2(%arg0: i32) -> (i32, i32) {
    %c0_i32 = arith.constant 0 : i32
    %c0_i32_0 = arith.constant 0 : i32
    %c0_i32_1 = arith.constant 0 : i32
    return %c0_i32, %c0_i32_0 : i32, i32
  }
  func.func @transform_3(%arg0: i32) -> (i32, i32) {
    %c0_i32 = arith.constant 0 : i32
    %c0_i32_0 = arith.constant 0 : i32
    %c0_i32_1 = arith.constant 0 : i32
    return %c0_i32, %c0_i32_0 : i32, i32
  }
  func.func @transform_4(%arg0: i32) -> (i32, i32) {
    %c0_i32 = arith.constant 0 : i32
    %c0_i32_0 = arith.constant 0 : i32
    %c0_i32_1 = arith.constant 0 : i32
    return %c0_i32, %c0_i32_0 : i32, i32
  }
  func.func @transform_5(%arg0: i32) -> (i32, i32) {
    %c0_i32 = arith.constant 0 : i32
    %c0_i32_0 = arith.constant 0 : i32
    %c0_i32_1 = arith.constant 0 : i32
    return %c0_i32, %c0_i32_0 : i32, i32
  }
  func.func @transform_6(%arg0: i32) -> (i32, i32) {
    %c0_i32 = arith.constant 0 : i32
    %c0_i32_0 = arith.constant 0 : i32
    %c0_i32_1 = arith.constant 0 : i32
    return %c0_i32, %c0_i32_0 : i32, i32
  }
  func.func @transform_7(%arg0: i32) -> (i32, i32) {
    %c0_i32 = arith.constant 0 : i32
    %c0_i32_0 = arith.constant 0 : i32
    %c0_i32_1 = arith.constant 0 : i32
    return %c0_i32, %c0_i32_0 : i32, i32
  }
  func.func @transform_8(%arg0: i32) -> (i32, i32) {
    %c0_i32 = arith.constant 0 : i32
    %c0_i32_0 = arith.constant 0 : i32
    %c0_i32_1 = arith.constant 0 : i32
    return %c0_i32, %c0_i32_0 : i32, i32
  }
  func.func @transform_9(%arg0: i32) -> (i32, i32) {
    %c0_i32 = arith.constant 0 : i32
    %c0_i32_0 = arith.constant 0 : i32
    return %c0_i32, %arg0 : i32, i32
  }
}

</mosaic_0001>

<bundles_post_ra>
// kernel: tpu_custom_call.1
= control target key start
LH: loop header
LB: loop body
LE: loop exit
PB: predicated region body
PF: predicated region fallthrough
CT: control target
= control target key end

     0   :  { %s2127_s0 = inlined_call_operand.vmem [shape: bf16[32,128], index: 0, kind: input, shape index: {}]   ;;  %s2128_s1 = inlined_call_operand.vmem [shape: bf16[64,32], index: 1, kind: input, shape index: {}]   ;;  %s2129_s2 = inlined_call_operand.vmem [shape: f32[64,1], index: 2, kind: input, shape index: {}]   ;;  %s2130_s3 = inlined_call_operand.vmem [shape: bf16[128,64], index: 3, kind: input, shape index: {}]   ;;  %s2131_s4 = inlined_call_operand.vmem [shape: f32[128,1], index: 4, kind: input, shape index: {}]   ;;  %s2132_s5 = inlined_call_operand.vmem [shape: bf16[256,128], index: 5, kind: input, shape index: {}]   ;;  %s2133_s6 = inlined_call_operand.vmem [shape: f32[256,1], index: 6, kind: input, shape index: {}]   ;;  %s2134_s7 = inlined_call_operand.vmem [shape: f32[256,1], index: 7, kind: input, shape index: {}]   ;;  %s2135_s8 = inlined_call_operand.<no memory space> [shape: f32[1,1], index: 8, kind: input, shape index: {}]   ;;  %s2136_s9 = inlined_call_operand.hbm [shape: f32[1,128], index: 9, kind: output, shape index: {}]  }
   0x1   :  { %v14_v0 = vstv %s2135_s8 }
   0x2   :  { %15 = vst [vmem:[#allocation2] sm:$0x1] %v14_v0 }
   0x3   :  { %v54_v1 = vld [vmem:[%s2129_s2 + $0x30] sm:$0xff]  ;;  %v52_v2 = vld [vmem:[%s2129_s2 + $0x20] sm:$0xff]  ;;  %v1568_v3 = vmov 0   ;;  %v1512_v4 = vld [vmem:[%s2127_s0 + $0x8] sm:$0xff]   ;;  %vm128_vm0 = vcmask 261120  }
   0x4   :  { %1511 = vset.pattern.permute.xlu1 %v1568_v3  ;;  %1510 = vset.pattern.permute.xlu0 %v1568_v3  ;;  %v55_v5 = vld [vmem:[%s2129_s2 + $0x38] sm:$0xff]  ;;  %v53_v6 = vld [vmem:[%s2129_s2 + $0x28] sm:$0xff]  ;;  %v1513_v7 = vld [vmem:[%s2127_s0] sm:$0xff]  }
   0x5   :  { %88 = vperm.xlu0 %1510, %v54_v1   ;;  %78 = vperm.xlu1 %1511, %v52_v2   ;;  %v1514_v8 = vld [vmem:[%s2128_s1] sm:$0xff]   ;;  %v51_v9 = vld [vmem:[%s2129_s2 + $0x18] sm:$0xff]  ;;  %v50_v10 = vld [vmem:[%s2129_s2 + $0x10] sm:$0xff] }
   0x6   :  { %1408 = vmatprep.subr.bf16.mxu0 %v1512_v4  ;;  %1412 = vmatprep.mubr.msk.bf16.mxu0 %vm128_vm0, %v1514_v8  ;;  %v1515_v11 = vld [vmem:[%s2128_s1 + $0x8] sm:$0xff]   ;;  %v1516_v12 = vld [vmem:[%s2128_s1 + $0x10] sm:$0xff]   ;;  %v48_v14 = vld [vmem:[%s2129_s2] sm:$0xff] }
   0x7   :  { %1409 = vmatpush3.bf16.msra.mxu0 %v1512_v4  ;;  %v49_v13 = vld [vmem:[%s2129_s2 + $0x8] sm:$0xff]  ;;  %v249_v15 = vld [vmem:[%s2131_s4 + $0x78] sm:$0xff]  ;;  %v248_v16 = vld [vmem:[%s2131_s4 + $0x70] sm:$0xff] }
   0x8   :  { %1410 = vmatprep.subr.bf16.mxu0 %v1513_v7  ;;  %v1517_v17 = vld [vmem:[%s2128_s1 + $0x18] sm:$0xff]   ;;  %v247_v18 = vld [vmem:[%s2131_s4 + $0x68] sm:$0xff]  ;;  %v246_v19 = vld [vmem:[%s2131_s4 + $0x60] sm:$0xff] }
   0x9   :  { %93 = vperm.xlu0 %1510, %v55_v5   ;;  %83 = vperm.xlu1 %1511, %v53_v6   ;;  %v245_v20 = vld [vmem:[%s2131_s4 + $0x58] sm:$0xff]  ;;  %v244_v21 = vld [vmem:[%s2131_s4 + $0x50] sm:$0xff]  ;;  %v243_v22 = vld [vmem:[%s2131_s4 + $0x48] sm:$0xff] }
   0xa   :  { %v242_v23 = vld [vmem:[%s2131_s4 + $0x40] sm:$0xff]  ;;  %v241_v24 = vld [vmem:[%s2131_s4 + $0x38] sm:$0xff]  ;;  %v240_v25 = vld [vmem:[%s2131_s4 + $0x30] sm:$0xff] }
   0xb   :  { %1411 = vmatpush3.bf16.msra.mxu0 %v1513_v7  ;;  %v239_v26 = vld [vmem:[%s2131_s4 + $0x28] sm:$0xff]  ;;  %v238_v27 = vld [vmem:[%s2131_s4 + $0x20] sm:$0xff]  ;;  %v237_v28 = vld [vmem:[%s2131_s4 + $0x18] sm:$0xff] }
   0xc   :  { %v236_v29 = vld [vmem:[%s2131_s4 + $0x10] sm:$0xff]  ;;  %v235_v30 = vld [vmem:[%s2131_s4 + $0x8] sm:$0xff]  ;;  %v234_v31 = vld [vmem:[%s2131_s4] sm:$0xff] }
   0xd   :  { %73 = vperm.xlu1 %1511, %v51_v9   ;;  %68 = vperm.xlu0 %1510, %v50_v10   ;;  %v549_v32 = vld [vmem:[%s2133_s6 + $0x8] sm:$0xff]  ;;  %v548_v33 = vld [vmem:[%s2133_s6] sm:$0xff]  ;;  %v551_v34 = vld [vmem:[%s2133_s6 + $0x18] sm:$0xff] }
   0xe   :  { %1413 = vmatmul.mubr.msk.bf16.vlgmr.msra.gmra.mxu0 %vm128_vm0, %v1515_v11  ;;  %v550_v35 = vld [vmem:[%s2133_s6 + $0x10] sm:$0xff] }
   0xf   :  { %1416 = vmatprep.mubr.msk.bf16.mxu0 %vm128_vm0, %v1516_v12 }
  0x11   :  { %63 = vperm.xlu1 %1511, %v49_v13   ;;  %58 = vperm.xlu0 %1510, %v48_v14  }
  0x15   :  { %327 = vperm.xlu1 %1511, %v249_v15   ;;  %322 = vperm.xlu0 %1510, %v248_v16  }
  0x16   :  { %1417 = vmatmul.mubr.msk.bf16.gmra.mxu0 %vm128_vm0, %v1517_v17 }
  0x19   :  { %317 = vperm.xlu1 %1511, %v247_v18   ;;  %312 = vperm.xlu0 %1510, %v246_v19  }
  0x1d   :  { %307 = vperm.xlu1 %1511, %v245_v20   ;;  %302 = vperm.xlu0 %1510, %v244_v21  }
  0x21   :  { %297 = vperm.xlu1 %1511, %v243_v22   ;;  %292 = vperm.xlu0 %1510, %v242_v23  }
  0x25   :  { %287 = vperm.xlu1 %1511, %v241_v24   ;;  %282 = vperm.xlu0 %1510, %v240_v25  }
  0x29   :  { %277 = vperm.xlu1 %1511, %v239_v26   ;;  %272 = vperm.xlu0 %1510, %v238_v27  }
  0x2d   :  { %267 = vperm.xlu1 %1511, %v237_v28   ;;  %262 = vperm.xlu0 %1510, %v236_v29  }
  0x31   :  { %257 = vperm.xlu1 %1511, %v235_v30   ;;  %252 = vperm.xlu0 %1510, %v234_v31  }
  0x35   :  { %587 = vperm.xlu1 %1511, %v549_v32   ;;  %582 = vperm.xlu0 %1510, %v548_v33  }
  0x36   :  { %16 = vsyncpa [#allocation4], 0  ;;  %v553_v36 = vld [vmem:[%s2133_s6 + $0x28] sm:$0xff]  ;;  %v552_v37 = vld [vmem:[%s2133_s6 + $0x20] sm:$0xff]  ;;  %vm370_vm1 = vcmask 523264  }
  0x37   :  { %v555_v38 = vld [vmem:[%s2133_s6 + $0x38] sm:$0xff]  ;;  %v554_v39 = vld [vmem:[%s2133_s6 + $0x30] sm:$0xff]  ;;  %v557_v40 = vld [vmem:[%s2133_s6 + $0x48] sm:$0xff] }
  0x38   :  { %v556_v41 = vld [vmem:[%s2133_s6 + $0x40] sm:$0xff]  ;;  %v559_v42 = vld [vmem:[%s2133_s6 + $0x58] sm:$0xff]  ;;  %v558_v43 = vld [vmem:[%s2133_s6 + $0x50] sm:$0xff] }
  0x39   :  { %597 = vperm.xlu1 %1511, %v551_v34   ;;  %592 = vperm.xlu0 %1510, %v550_v35   ;;  %v561_v44 = vld [vmem:[%s2133_s6 + $0x68] sm:$0xff]  ;;  %v560_v45 = vld [vmem:[%s2133_s6 + $0x60] sm:$0xff]  ;;  %v563_v46 = vld [vmem:[%s2133_s6 + $0x78] sm:$0xff] }
  0x3a   :  { %v562_v47 = vld [vmem:[%s2133_s6 + $0x70] sm:$0xff]  ;;  %v565_v48 = vld [vmem:[%s2133_s6 + $0x88] sm:$0xff]  ;;  %v564_v49 = vld [vmem:[%s2133_s6 + $0x80] sm:$0xff] }
  0x3b   :  { %v567_v50 = vld [vmem:[%s2133_s6 + $0x98] sm:$0xff]  ;;  %v566_v51 = vld [vmem:[%s2133_s6 + $0x90] sm:$0xff]  ;;  %v1029_v52 = vld [vmem:[%s2134_s7] sm:$0xff] }
  0x3c   :  { %v568_v53 = vld [vmem:[%s2133_s6 + $0xa0] sm:$0xff]  ;;  %v1031_v54 = vld [vmem:[%s2134_s7 + $0x10] sm:$0xff]  ;;  %v1030_v55 = vld [vmem:[%s2134_s7 + $0x8] sm:$0xff] }
  0x3d   :  { %607 = vperm.xlu1 %1511, %v553_v36   ;;  %602 = vperm.xlu0 %1510, %v552_v37   ;;  %v1033_v56 = vld [vmem:[%s2134_s7 + $0x20] sm:$0xff]  ;;  %v1032_v57 = vld [vmem:[%s2134_s7 + $0x18] sm:$0xff]  ;;  %v1035_v58 = vld [vmem:[%s2134_s7 + $0x30] sm:$0xff] }
  0x3e   :  { %v1034_v59 = vld [vmem:[%s2134_s7 + $0x28] sm:$0xff]  ;;  %v1037_v60 = vld [vmem:[%s2134_s7 + $0x40] sm:$0xff]  ;;  %v1036_v61 = vld [vmem:[%s2134_s7 + $0x38] sm:$0xff] }
  0x3f   :  { %v1039_v62 = vld [vmem:[%s2134_s7 + $0x50] sm:$0xff]  ;;  %v1038_v63 = vld [vmem:[%s2134_s7 + $0x48] sm:$0xff]  ;;  %v1518_v0 = vld [vmem:[%s2130_s3] sm:$0xff]  }
  0x40   :  { %v1041_v1 = vld [vmem:[%s2134_s7 + $0x60] sm:$0xff]  ;;  %v1040_v2 = vld [vmem:[%s2134_s7 + $0x58] sm:$0xff]  ;;  %1428 = vmatprep.mubr.msk.bf16.mxu1 %vm370_vm1, %v1518_v0  ;;  %v1043_v3 = vld [vmem:[%s2134_s7 + $0x70] sm:$0xff] }
  0x41   :  { %617 = vperm.xlu1 %1511, %v555_v38   ;;  %612 = vperm.xlu0 %1510, %v554_v39   ;;  %v1042_v4 = vld [vmem:[%s2134_s7 + $0x68] sm:$0xff]  ;;  %v1045_v5 = vld [vmem:[%s2134_s7 + $0x80] sm:$0xff]  ;;  %v1044_v6 = vld [vmem:[%s2134_s7 + $0x78] sm:$0xff] }
  0x42   :  { %v1047_v7 = vld [vmem:[%s2134_s7 + $0x90] sm:$0xff]  ;;  %v1046_v8 = vld [vmem:[%s2134_s7 + $0x88] sm:$0xff]  ;;  %v1048_v9 = vld [vmem:[%s2134_s7 + $0x98] sm:$0xff] }
  0x43   :  { %v569_v10 = vld [vmem:[%s2133_s6 + $0xa8] sm:$0xff]  ;;  %v1049_v11 = vld [vmem:[%s2134_s7 + $0xa0] sm:$0xff]  ;;  %v570_v12 = vld [vmem:[%s2133_s6 + $0xb0] sm:$0xff] }
  0x44   :  { %v1050_v13 = vld [vmem:[%s2134_s7 + $0xa8] sm:$0xff]  ;;  %v571_v14 = vld [vmem:[%s2133_s6 + $0xb8] sm:$0xff]  ;;  %v1051_v15 = vld [vmem:[%s2134_s7 + $0xb0] sm:$0xff] }
  0x45   :  { %627 = vperm.xlu1 %1511, %v557_v40   ;;  %622 = vperm.xlu0 %1510, %v556_v41   ;;  %v572_v16 = vld [vmem:[%s2133_s6 + $0xc0] sm:$0xff]  ;;  %v1052_v17 = vld [vmem:[%s2134_s7 + $0xb8] sm:$0xff]  ;;  %v573_v18 = vld [vmem:[%s2133_s6 + $0xc8] sm:$0xff] }
  0x46   :  { %v1053_v19 = vld [vmem:[%s2134_s7 + $0xc0] sm:$0xff]  ;;  %v574_v20 = vld [vmem:[%s2133_s6 + $0xd0] sm:$0xff]  ;;  %v1054_v21 = vld [vmem:[%s2134_s7 + $0xc8] sm:$0xff] }
  0x47   :  { %v575_v22 = vld [vmem:[%s2133_s6 + $0xd8] sm:$0xff]  ;;  %v1055_v23 = vld [vmem:[%s2134_s7 + $0xd0] sm:$0xff]  ;;  %v576_v24 = vld [vmem:[%s2133_s6 + $0xe0] sm:$0xff] }
  0x48   :  { %v1056_v25 = vld [vmem:[%s2134_s7 + $0xd8] sm:$0xff]  ;;  %v577_v26 = vld [vmem:[%s2133_s6 + $0xe8] sm:$0xff]  ;;  %v1057_v27 = vld [vmem:[%s2134_s7 + $0xe0] sm:$0xff] }
  0x49   :  { %637 = vperm.xlu1 %1511, %v559_v42   ;;  %632 = vperm.xlu0 %1510, %v558_v43   ;;  %v578_v28 = vld [vmem:[%s2133_s6 + $0xf0] sm:$0xff]  ;;  %v1058_v29 = vld [vmem:[%s2134_s7 + $0xe8] sm:$0xff]  ;;  %v579_v30 = vld [vmem:[%s2133_s6 + $0xf8] sm:$0xff] }
  0x4a   :  { %v1060_v31 = vld [vmem:[%s2134_s7 + $0xf8] sm:$0xff]  ;;  %v1059_v32 = vld [vmem:[%s2134_s7 + $0xf0] sm:$0xff]  ;;  %v1290_v33 = vld [vmem:[#allocation2] sm:$0x1] }
  0x4d   :  { %647 = vperm.xlu1 %1511, %v561_v44   ;;  %642 = vperm.xlu0 %1510, %v560_v45  }
  0x51   :  { %657 = vperm.xlu1 %1511, %v563_v46   ;;  %652 = vperm.xlu0 %1510, %v562_v47  }
  0x55   :  { %667 = vperm.xlu1 %1511, %v565_v48   ;;  %662 = vperm.xlu0 %1510, %v564_v49  }
  0x59   :  { %677 = vperm.xlu1 %1511, %v567_v50   ;;  %672 = vperm.xlu0 %1510, %v566_v51  }
  0x5d   :  { %1063 = vperm.xlu1 %1511, %v1029_v52   ;;  %682 = vperm.xlu0 %1510, %v568_v53  }
  0x61   :  { %1073 = vperm.xlu1 %1511, %v1031_v54   ;;  %1068 = vperm.xlu0 %1510, %v1030_v55  }
  0x65   :  { %1083 = vperm.xlu1 %1511, %v1033_v56   ;;  %1078 = vperm.xlu0 %1510, %v1032_v57  }
  0x69   :  { %1093 = vperm.xlu1 %1511, %v1035_v58   ;;  %1088 = vperm.xlu0 %1510, %v1034_v59  }
  0x6d   :  { %1103 = vperm.xlu1 %1511, %v1037_v60   ;;  %1098 = vperm.xlu0 %1510, %v1036_v61  }
  0x71   :  { %1113 = vperm.xlu1 %1511, %v1039_v62   ;;  %1108 = vperm.xlu0 %1510, %v1038_v63  }
  0x75   :  { %1123 = vperm.xlu1 %1511, %v1041_v1   ;;  %1118 = vperm.xlu0 %1510, %v1040_v2  }
  0x79   :  { %1133 = vperm.xlu1 %1511, %v1043_v3   ;;  %1128 = vperm.xlu0 %1510, %v1042_v4  }
  0x7d   :  { %1143 = vperm.xlu1 %1511, %v1045_v5   ;;  %1138 = vperm.xlu0 %1510, %v1044_v6   ;;  %v1519_v6 = vld [vmem:[%s2130_s3 + $0x8] sm:$0xff]  }
  0x80   :  { %v79_v35 = vpop.permute.xlu1 %78  ;;  %v89_v36 = vpop.permute.xlu0 %88 }
  0x81   :  { %1153 = vperm.xlu1 %1511, %v1047_v7   ;;  %1148 = vperm.xlu0 %1510, %v1046_v8   ;;  %v1520_v7 = vld [vmem:[%s2130_s3 + $0x10] sm:$0xff]   ;;  %v1521_v8 = vld [vmem:[%s2130_s3 + $0x18] sm:$0xff]  }
  0x84   :  { %v84_v39 = vpop.permute.xlu1 %83  ;;  %v94_v41 = vpop.permute.xlu0 %93 }
  0x85   :  { %1158 = vperm.xlu1 %1511, %v1048_v9   ;;  %687 = vperm.xlu0 %1510, %v569_v10   ;;  %v1522_v9 = vld [vmem:[%s2130_s3 + $0x20] sm:$0xff]   ;;  %v1523_v10 = vld [vmem:[%s2130_s3 + $0x28] sm:$0xff]  }
  0x88   :  { %v74_v45 = vpop.permute.xlu1 %73  ;;  %v69_v49 = vpop.permute.xlu0 %68 }
  0x89   :  { %1163 = vperm.xlu1 %1511, %v1049_v11   ;;  %692 = vperm.xlu0 %1510, %v570_v12   ;;  %v1524_v11 = vld [vmem:[%s2130_s3 + $0x30] sm:$0xff]   ;;  %v1525_v12 = vld [vmem:[%s2130_s3 + $0x38] sm:$0xff]  }
  0x8c   :  { %v64_v59 = vpop.permute.xlu1 %63  ;;  %v59_v63 = vpop.permute.xlu0 %58 }
  0x8d   :  { %1168 = vperm.xlu1 %1511, %v1050_v13   ;;  %697 = vperm.xlu0 %1510, %v571_v14   ;;  %v1526_v13 = vld [vmem:[%s2132_s5] sm:$0xff]   ;;  %v1527_v14 = vld [vmem:[%s2132_s5 + $0x50] sm:$0xff]  }
  0x8e   :  { %1460 = vmatprep.mubr.bf16.mxu0 %v1526_v13 }
  0x91   :  { %1173 = vperm.xlu1 %1511, %v1051_v15   ;;  %702 = vperm.xlu0 %1510, %v572_v16  }
  0x95   :  { %1178 = vperm.xlu1 %1511, %v1052_v17   ;;  %707 = vperm.xlu0 %1510, %v573_v18  }
  0x99   :  { %1183 = vperm.xlu1 %1511, %v1053_v19   ;;  %712 = vperm.xlu0 %1510, %v574_v20   ;;  %v328_v19 = vpop.permute.xlu1 %327 }
  0x9d   :  { %1188 = vperm.xlu1 %1511, %v1054_v21   ;;  %717 = vperm.xlu0 %1510, %v575_v22   ;;  %v323_v21 = vpop.permute.xlu0 %322 }
  0xa1   :  { %1193 = vperm.xlu1 %1511, %v1055_v23   ;;  %722 = vperm.xlu0 %1510, %v576_v24   ;;  %v318_v24 = vpop.permute.xlu1 %317 }
  0xa5   :  { %1198 = vperm.xlu1 %1511, %v1056_v25   ;;  %727 = vperm.xlu0 %1510, %v577_v26   ;;  %v313_v26 = vpop.permute.xlu0 %312 }
  0xa9   :  { %1203 = vperm.xlu1 %1511, %v1057_v27   ;;  %732 = vperm.xlu0 %1510, %v578_v28  }
  0xad   :  { %1208 = vperm.xlu1 %1511, %v1058_v29   ;;  %737 = vperm.xlu0 %1510, %v579_v30   ;;  %v308_v29 = vpop.permute.xlu1 %307 }
  0xb1   :  { %1218 = vperm.xlu1 %1511, %v1060_v31   ;;  %1213 = vperm.xlu0 %1510, %v1059_v32   ;;  %v303_v31 = vpop.permute.xlu0 %302 }
  0xb5   :  { %1293 = vperm.xlu0 %1510, %v1290_v33  }
  0xce   :  { %v1414_v34 = vpop.f32.mrf.mxu0 }
  0xcf   :  { %v184_v55 = vadd.f32 %v1414_v34, %v69_v49  ;;  %v298_v34 = vpop.permute.xlu1 %297 }
  0xd0   :  { %v175_v37 = vpop.f32.mrf.mxu0 }
  0xd1   :  { %v208_v0 = vmax.f32 %v184_v55, 0.0  ;;  %v176_v1 = vadd.f32 %v175_v37, %v59_v63  ;;  %v293_v37 = vpop.permute.xlu0 %292 }
  0xd2   :  { %v1415_v38 = vpop.f32.mrf.mxu0 }
  0xd3   :  { %v187_v51 = vadd.f32 %v1415_v38, %v74_v45  ;;  %v206_v4 = vmax.f32 %v176_v1, 0.0 }
  0xd4   :  { %v178_v40 = vpop.f32.mrf.mxu0 }
  0xd5   :  { %v209_v60 = vmax.f32 %v187_v51, 0.0  ;;  %v179_v61 = vadd.f32 %v178_v40, %v64_v59  ;;  %v283_v51 = vpop.permute.xlu0 %282 }
  0xd6   :  { %v1418_v42 = vpop.f32.mrf.mxu0 }
  0xd7   :  { %v200_v44 = vadd.f32 %v1418_v42, %v89_v36  ;;  %v231_v2 = vpack.c.bf16 %v209_v60, %v208_v0  ;;  %v207_v3 = vmax.f32 %v179_v61, 0.0 }
  0xd8   :  { %v191_v43 = vpop.f32.mrf.mxu0 }
  0xd9   :  { %v192_v47 = vadd.f32 %v191_v43, %v79_v35  ;;  %v212_v52 = vmax.f32 %v200_v44, 0.0  ;;  %v230_v5 = vpack.c.bf16 %v207_v3, %v206_v4  ;;  %v273_v61 = vpop.permute.xlu0 %272 }
  0xda   :  { %v1419_v46 = vpop.f32.mrf.mxu0 }
  0xdb   :  { %v203_v48 = vadd.f32 %v1419_v46, %v94_v41  ;;  %v210_v56 = vmax.f32 %v192_v47, 0.0  ;;  %v288_v46 = vpop.permute.xlu1 %287 }
  0xdc   :  { %v194_v50 = vpop.f32.mrf.mxu0 }
  0xdd   :  { %v213_v53 = vmax.f32 %v203_v48, 0.0  ;;  %v195_v54 = vadd.f32 %v194_v50, %v84_v39 }
  0xdf   :  { %v211_v57 = vmax.f32 %v195_v54, 0.0  ;;  %v233_v58 = vpack.c.bf16 %v213_v53, %v212_v52 }
  0xe1   :  { %v232_v62 = vpack.c.bf16 %v211_v57, %v210_v56  ;;  %1420 = vmatprep.subr.bf16.mxu1 %v233_v58  ;;  %v278_v57 = vpop.permute.xlu1 %277 }
  0xe2   :  { %1421 = vmatpush3.bf16.msra.mxu1 %v233_v58 }
  0xe3   :  { %1422 = vmatprep.subr.bf16.mxu1 %v232_v62 }
  0xe5   :  { %v268_v3 = vpop.permute.xlu1 %267 }
  0xe6   :  { %1423 = vmatpush3.bf16.msra.mxu1 %v232_v62 }
  0xe7   :  { %1424 = vmatprep.subr.bf16.mxu1 %v231_v2 }
  0xea   :  { %1425 = vmatpush3.bf16.msra.mxu1 %v231_v2 }
  0xeb   :  { %1426 = vmatprep.subr.bf16.mxu1 %v230_v5 }
  0xee   :  { %1427 = vmatpush3.bf16.msra.mxu1 %v230_v5 }
  0xf1   :  { %1429 = vmatmul.mubr.msk.bf16.vlgmr.msra.gmra.mxu1 %vm370_vm1, %v1519_v6  ;;  %v263_v6 = vpop.permute.xlu0 %262 }
  0xf2   :  { %1432 = vmatprep.mubr.msk.bf16.mxu1 %vm370_vm1, %v1520_v7 }
  0xf9   :  { %1433 = vmatmul.mubr.msk.bf16.gmra.mxu1 %vm370_vm1, %v1521_v8 }
  0xfa   :  { %1436 = vmatprep.mubr.msk.bf16.mxu1 %vm370_vm1, %v1522_v9 }
 0x101   :  { %1437 = vmatmul.mubr.msk.bf16.gmra.mxu1 %vm370_vm1, %v1523_v10 }
 0x102   :  { %1440 = vmatprep.mubr.msk.bf16.mxu1 %vm370_vm1, %v1524_v11 }
 0x109   :  { %1441 = vmatmul.mubr.msk.bf16.gmra.mxu1 %vm370_vm1, %v1525_v12  ;;  %v258_v12 = vpop.permute.xlu1 %257 }
 0x10a   :  { %1480 = vmatprep.mubr.bf16.mxu1 %v1527_v14 }
 0x1b1   :  { %v1947_v15 = vpop.f32.mrf.mxu1 }
 0x1b2   :  { %v438_v10 = vadd.f32 %v1947_v15, %v263_v6 }
 0x1b3   :  { %v1949_v16 = vpop.f32.mrf.mxu1 }
 0x1b5   :  { %v1951_v17 = vpop.f32.mrf.mxu1 }
 0x1b6   :  { %v441_v7 = vadd.f32 %v1951_v17, %v268_v3 }
 0x1b7   :  { %v1953_v18 = vpop.f32.mrf.mxu1 }
 0x1b8   :  { %v495_v13 = vmax.f32 %v441_v7, 0.0  ;;  %v433_v14 = vadd.f32 %v1953_v18, %v258_v12  ;;  %v1528_v18 = vld [vmem:[%s2132_s5 + $0x8] sm:$0xff]  }
 0x1b9   :  { %v1434_v20 = vpop.f32.mrf.mxu1 }
 0x1ba   :  { %v454_v62 = vadd.f32 %v1434_v20, %v283_v51  ;;  %v253_v20 = vpop.permute.xlu0 %252 }
 0x1bb   :  { %v445_v22 = vpop.f32.mrf.mxu1  ;;  %v430_v17 = vadd.f32 %v1949_v16, %v253_v20  ;;  %v1529_v16 = vld [vmem:[%s2132_s5 + $0x58] sm:$0xff]  }
 0x1bc   :  { %v498_v4 = vmax.f32 %v454_v62, 0.0  ;;  %v446_v5 = vadd.f32 %v445_v22, %v273_v61 }
 0x1bd   :  { %v1435_v23 = vpop.f32.mrf.mxu1  ;;  %v492_v15 = vmax.f32 %v430_v17, 0.0 }
 0x1be   :  { %v457_v58 = vadd.f32 %v1435_v23, %v288_v46  ;;  %v496_v11 = vmax.f32 %v446_v5, 0.0  ;;  %v493_v23 = vmax.f32 %v433_v14, 0.0 }
 0x1bf   :  { %v448_v25 = vpop.f32.mrf.mxu1 }
 0x1c0   :  { %v499_v0 = vmax.f32 %v457_v58, 0.0  ;;  %v449_v1 = vadd.f32 %v448_v25, %v278_v57  ;;  %v1530_v25 = vld [vmem:[%s2132_s5 + $0x10] sm:$0xff]  }
 0x1c1   :  { %v1438_v27 = vpop.f32.mrf.mxu1 }
 0x1c2   :  { %v470_v47 = vadd.f32 %v1438_v27, %v303_v31  ;;  %v543_v8 = vpack.c.bf16 %v499_v0, %v498_v4  ;;  %v497_v9 = vmax.f32 %v449_v1, 0.0  ;;  %v1532_v27 = vld [vmem:[%s2132_s5 + $0x18] sm:$0xff]   ;;  %v1536_v31 = vld [vmem:[%s2132_s5 + $0x28] sm:$0xff]  }
 0x1c3   :  { %v461_v28 = vpop.f32.mrf.mxu1 }
 0x1c4   :  { %v502_v55 = vmax.f32 %v470_v47, 0.0  ;;  %v462_v56 = vadd.f32 %v461_v28, %v293_v37  ;;  %v1533_v28 = vld [vmem:[%s2132_s5 + $0x68] sm:$0xff]   ;;  %v583_v37 = vpop.permute.xlu0 %582 }
 0x1c5   :  { %v1439_v30 = vpop.f32.mrf.mxu1 }
 0x1c6   :  { %v473_v42 = vadd.f32 %v1439_v30, %v308_v29  ;;  %v500_v63 = vmax.f32 %v462_v56, 0.0  ;;  %v1534_v29 = vld [vmem:[%s2132_s5 + $0x20] sm:$0xff]   ;;  %v1535_v30 = vld [vmem:[%s2132_s5 + $0x70] sm:$0xff]  }
 0x1c7   :  { %v464_v32 = vpop.f32.mrf.mxu1 }
 0x1c8   :  { %v503_v52 = vmax.f32 %v473_v42, 0.0  ;;  %v465_v53 = vadd.f32 %v464_v32, %v298_v34  ;;  %v1537_v32 = vld [vmem:[%s2132_s5 + $0x78] sm:$0xff]  }
 0x1c9   :  { %v1442_v33 = vpop.f32.mrf.mxu1  ;;  %v1539_v34 = vld [vmem:[%s2132_s5 + $0x38] sm:$0xff]  }
 0x1ca   :  { %v486_v36 = vadd.f32 %v1442_v33, %v323_v21  ;;  %v545_v59 = vpack.c.bf16 %v503_v52, %v502_v55  ;;  %v501_v60 = vmax.f32 %v465_v53, 0.0  ;;  %v494_v21 = vmax.f32 %v438_v10, 0.0  ;;  %v1538_v33 = vld [vmem:[%s2132_s5 + $0x30] sm:$0xff]  }
 0x1cb   :  { %v477_v35 = vpop.f32.mrf.mxu1 }
 0x1cc   :  { %v478_v39 = vadd.f32 %v477_v35, %v313_v26  ;;  %v506_v43 = vmax.f32 %v486_v36, 0.0  ;;  %v544_v2 = vpack.c.bf16 %v501_v60, %v500_v63  ;;  %v541_v22 = vpack.c.bf16 %v495_v13, %v494_v21  ;;  %v1531_v26 = vld [vmem:[%s2132_s5 + $0x60] sm:$0xff]   ;;  %v1541_v36 = vld [vmem:[%s2132_s5 + $0x48] sm:$0xff]  }
 0x1cd   :  { %v1443_v38 = vpop.f32.mrf.mxu1  ;;  %v1540_v35 = vld [vmem:[%s2132_s5 + $0x40] sm:$0xff]   ;;  %s1569_s5 = smov [#allocation3]  }
 0x1ce   :  { %v489_v40 = vadd.f32 %v1443_v38, %v328_v19  ;;  %v504_v48 = vmax.f32 %v478_v39, 0.0  ;;  %v542_v19 = vpack.c.bf16 %v497_v9, %v496_v11  ;;  %v588_v38 = vpop.permute.xlu1 %587  ;;  %v593_v39 = vpop.permute.xlu0 %592  ;;  %s1315_s12 = sshll.u32 %s1569_s5, 4  ;;  %s1316_s12 = int_to_ptr.vmem [resolvable:$true] %s1315_s12 }
 0x1cf   :  { %v480_v41 = vpop.f32.mrf.mxu1  ;;  %s1546_s3 = scalar_lea.vmem %s1316_s12, 16  ;;  %s1550_s13 = scalar_lea.vmem %s1316_s12, 32 }
 0x1d0   :  { %v507_v44 = vmax.f32 %v489_v40, 0.0  ;;  %v481_v45 = vadd.f32 %v480_v41, %v318_v24  ;;  %v540_v24 = vpack.c.bf16 %v493_v23, %v492_v15  ;;  %p1547_p0 = scmp.ne.s32.totalorder %s1316_s12, %s1546_s3  ;;  %p1551_p1 = scmp.lt.s32.totalorder %s1316_s12, %s1316_s12 }
 0x1d1   :  { %p1552_p2 = scmp.lt.s32.totalorder %s1550_s13, %s1546_s3 }
 0x1d2   :  { %v547_v49 = vpack.c.bf16 %v507_v44, %v506_v43  ;;  %v505_v50 = vmax.f32 %v481_v45, 0.0  ;;  %v598_v40 = vpop.permute.xlu1 %597  ;;  %v603_v41 = vpop.permute.xlu0 %602 }
 0x1d3   :  { %p1553_p3 = por %p1552_p2, %p1551_p1 }
 0x1d4   :  { %v546_v54 = vpack.c.bf16 %v505_v50, %v504_v48  ;;  %1444 = vmatprep.subr.bf16.mxu0 %v547_v49  ;;  %1492 = vmatprep.subr.bf16.mxu1 %v547_v49 }
 0x1d5   :  { %1445 = vmatpush3.bf16.msra.mxu0 %v547_v49  ;;  %1500 = vmatpush3.bf16.msra.mxu1 %v547_v49  ;;  %p1554_p4 = pnand %p1553_p3, %p1547_p0 }
 0x1d6   :  { %1446 = vmatprep.subr.bf16.mxu0 %v546_v54  ;;  %1493 = vmatprep.subr.bf16.mxu1 %v546_v54  ;;  %v2001_v42 = vpop.permute.xlu1 %607  ;;  %v613_v43 = vpop.permute.xlu0 %612 }
 0x1d9   :  { %1447 = vmatpush3.bf16.msra.mxu0 %v546_v54  ;;  %1501 = vmatpush3.bf16.msra.mxu1 %v546_v54 }
 0x1da   :  { %1448 = vmatprep.subr.bf16.mxu0 %v545_v59  ;;  %1494 = vmatprep.subr.bf16.mxu1 %v545_v59  ;;  %v2003_v44 = vpop.permute.xlu1 %617  ;;  %v2005_v45 = vpop.permute.xlu0 %622 }
 0x1dd   :  { %1449 = vmatpush3.bf16.msra.mxu0 %v545_v59  ;;  %1502 = vmatpush3.bf16.msra.mxu1 %v545_v59 }
 0x1de   :  { %1450 = vmatprep.subr.bf16.mxu0 %v544_v2  ;;  %1495 = vmatprep.subr.bf16.mxu1 %v544_v2  ;;  %v2007_v46 = vpop.permute.xlu1 %627  ;;  %v2009_v47 = vpop.permute.xlu0 %632 }
 0x1e1   :  { %1451 = vmatpush3.bf16.msra.mxu0 %v544_v2  ;;  %1503 = vmatpush3.bf16.msra.mxu1 %v544_v2 }
 0x1e2   :  { %1452 = vmatprep.subr.bf16.mxu0 %v543_v8  ;;  %1496 = vmatprep.subr.bf16.mxu1 %v543_v8  ;;  %v2011_v48 = vpop.permute.xlu1 %637  ;;  %v2013_v49 = vpop.permute.xlu0 %642 }
 0x1e5   :  { %1453 = vmatpush3.bf16.msra.mxu0 %v543_v8  ;;  %1504 = vmatpush3.bf16.msra.mxu1 %v543_v8 }
 0x1e6   :  { %1454 = vmatprep.subr.bf16.mxu0 %v542_v19  ;;  %1497 = vmatprep.subr.bf16.mxu1 %v542_v19  ;;  %v2015_v50 = vpop.permute.xlu1 %647  ;;  %v2017_v51 = vpop.permute.xlu0 %652 }
 0x1e9   :  { %1455 = vmatpush3.bf16.msra.mxu0 %v542_v19  ;;  %1505 = vmatpush3.bf16.msra.mxu1 %v542_v19 }
 0x1ea   :  { %1456 = vmatprep.subr.bf16.mxu0 %v541_v22  ;;  %1498 = vmatprep.subr.bf16.mxu1 %v541_v22  ;;  %v2019_v52 = vpop.permute.xlu1 %657  ;;  %v2021_v53 = vpop.permute.xlu0 %662 }
 0x1ed   :  { %1457 = vmatpush3.bf16.msra.mxu0 %v541_v22  ;;  %1506 = vmatpush3.bf16.msra.mxu1 %v541_v22 }
 0x1ee   :  { %1458 = vmatprep.subr.bf16.mxu0 %v540_v24  ;;  %1499 = vmatprep.subr.bf16.mxu1 %v540_v24  ;;  %v2023_v54 = vpop.permute.xlu1 %667  ;;  %v2025_v55 = vpop.permute.xlu0 %672 }
 0x1f1   :  { %1459 = vmatpush3.bf16.msra.mxu0 %v540_v24  ;;  %1507 = vmatpush3.bf16.msra.mxu1 %v540_v24 }
 0x1f2   :  { %v2027_v56 = vpop.permute.xlu1 %677  ;;  %v2029_v57 = vpop.permute.xlu0 %682 }
 0x1f4   :  { %1461 = vmatmul.mubr.bf16.vlgmr.msra.gmra.mxu0 %v1528_v18  ;;  %1481 = vmatmul.mubr.bf16.vlgmr.msra.gmra.mxu1 %v1529_v16 }
 0x1f5   :  { %1464 = vmatprep.mubr.bf16.mxu0 %v1530_v25  ;;  %1484 = vmatprep.mubr.bf16.mxu1 %v1531_v26 }
 0x1f6   :  { %v1064_v58 = vpop.permute.xlu1 %1063  ;;  %v1069_v59 = vpop.permute.xlu0 %1068 }
 0x1fa   :  { %v1074_v60 = vpop.permute.xlu1 %1073  ;;  %v1079_v61 = vpop.permute.xlu0 %1078 }
 0x1fc   :  { %1465 = vmatmul.mubr.bf16.gmra.mxu0 %v1532_v27  ;;  %1485 = vmatmul.mubr.bf16.gmra.mxu1 %v1533_v28 }
 0x1fd   :  { %1468 = vmatprep.mubr.bf16.mxu0 %v1534_v29  ;;  %1488 = vmatprep.mubr.bf16.mxu1 %v1535_v30 }
 0x1fe   :  { %v1084_v62 = vpop.permute.xlu1 %1083  ;;  %v1089_v63 = vpop.permute.xlu0 %1088 }
 0x202   :  { %v1094_v0 = vpop.permute.xlu1 %1093  ;;  %v2031_v1 = vpop.permute.xlu0 %1098 }
 0x204   :  { %1469 = vmatmul.mubr.bf16.gmra.mxu0 %v1536_v31  ;;  %1489 = vmatmul.mubr.bf16.gmra.mxu1 %v1537_v32 }
 0x205   :  { %1472 = vmatprep.mubr.bf16.mxu0 %v1538_v33 }
 0x206   :  { %v2033_v2 = vpop.permute.xlu1 %1103  ;;  %v2035_v3 = vpop.permute.xlu0 %1108 }
 0x20a   :  { %v2037_v4 = vpop.permute.xlu1 %1113  ;;  %v2039_v5 = vpop.permute.xlu0 %1118 }
 0x20c   :  { %1473 = vmatmul.mubr.bf16.gmra.mxu0 %v1539_v34 }
 0x20d   :  { %1476 = vmatprep.mubr.bf16.mxu0 %v1540_v35 }
 0x20e   :  { %v2041_v6 = vpop.permute.xlu1 %1123  ;;  %v2043_v7 = vpop.permute.xlu0 %1128 }
 0x212   :  { %v2045_v8 = vpop.permute.xlu1 %1133  ;;  %v2047_v9 = vpop.permute.xlu0 %1138 }
 0x214   :  { %1477 = vmatmul.mubr.bf16.gmra.mxu0 %v1541_v36 }
 0x216   :  { %v2049_v10 = vpop.permute.xlu1 %1143  ;;  %v2051_v11 = vpop.permute.xlu0 %1148 }
 0x21a   :  { %v2053_v12 = vpop.permute.xlu1 %1153  ;;  %v2055_v19 = vpop.permute.xlu0 %687 }
 0x21e   :  { %v2057_v17 = vpop.permute.xlu1 %1158  ;;  %v2059_v25 = vpop.permute.xlu0 %692 }
 0x222   :  { %v2061_v29 = vpop.permute.xlu1 %1163 }
 0x2b4   :  { %v1462_v13 = vpop.f32.mrf.mxu0  ;;  %v2063_v36 = vpop.f32.mrf.mxu1 }
 0x2b5   :  { %v879_v22 = vadd.f32 %v1462_v13, %v593_v39  ;;  %v2065_v13 = vpop.permute.xlu0 %697 }
 0x2b6   :  { %v870_v14 = vpop.f32.mrf.mxu0 }
 0x2b7   :  { %v871_v20 = vadd.f32 %v870_v14, %v583_v37  ;;  %v999_v26 = vmax.f32 %v879_v22, 0.0 }
 0x2b8   :  { %v1463_v21 = vpop.f32.mrf.mxu0 }
 0x2b9   :  { %v997_v15 = vmax.f32 %v871_v20, 0.0  ;;  %v882_v24 = vadd.f32 %v1463_v21, %v598_v40  ;;  %v1223_v35 = vmul.f32 %v1074_v60, %v999_v26 }
 0x2ba   :  { %v873_v23 = vpop.f32.mrf.mxu0 }
 0x2bb   :  { %v874_v18 = vadd.f32 %v873_v23, %v588_v38  ;;  %v1221_v30 = vmul.f32 %v1064_v58, %v997_v15  ;;  %v1000_v31 = vmax.f32 %v882_v24, 0.0  ;;  %v2069_v23 = vpop.permute.xlu1 %1168 }
 0x2bc   :  { %v1466_v16 = vpop.f32.mrf.mxu0 }
 0x2bd   :  { %v998_v27 = vmax.f32 %v874_v18, 0.0  ;;  %v895_v39 = vadd.f32 %v1466_v16, %v613_v43  ;;  %v1224_v14 = vmul.f32 %v1079_v61, %v1000_v31 }
 0x2be   :  { %v886_v28 = vpop.f32.mrf.mxu0 }
 0x2bf   :  { %v1222_v32 = vmul.f32 %v1069_v59, %v998_v27  ;;  %v887_v33 = vadd.f32 %v886_v28, %v603_v41  ;;  %v2071_v41 = vpop.f32.mrf.mxu1  ;;  %v1003_v59 = vmax.f32 %v895_v39, 0.0  ;;  %v2074_v28 = vpop.permute.xlu0 %702 }
 0x2c0   :  { %v1467_v34 = vpop.f32.mrf.mxu0 }
 0x2c1   :  { %v1253_v37 = vadd.f32 %v1222_v32, %v1221_v30  ;;  %v1001_v40 = vmax.f32 %v887_v33, 0.0  ;;  %v898_v21 = vadd.f32 %v1467_v34, %v2003_v44  ;;  %v2076_v44 = vpop.f32.mrf.mxu1 }
 0x2c2   :  { %v889_v38 = vpop.f32.mrf.mxu0 }
 0x2c3   :  { %v1254_v20 = vadd.f32 %v1253_v37, %v1223_v35  ;;  %v890_v22 = vadd.f32 %v889_v38, %v2001_v42  ;;  %v1225_v60 = vmul.f32 %v1084_v62, %v1001_v40  ;;  %v1004_v16 = vmax.f32 %v898_v21, 0.0  ;;  %v2079_v62 = vpop.permute.xlu1 %1173  ;;  %v953_v39 = vpop.f32.mrf.mxu1 }
 0x2c4   :  { %v1470_v58 = vpop.f32.mrf.mxu0  ;;  %v1227_v42 = vmul.f32 %v1094_v0, %v1003_v59  ;;  %v2085_v21 = vpop.permute.xlu0 %707 }
 0x2c5   :  { %v1255_v15 = vadd.f32 %v1254_v20, %v1224_v14  ;;  %v1002_v24 = vmax.f32 %v890_v22, 0.0  ;;  %v911_v32 = vadd.f32 %v1470_v58, %v2009_v47  ;;  %v1228_v34 = vmul.f32 %v2031_v1, %v1004_v16 }
 0x2c6   :  { %v902_v43 = vpop.f32.mrf.mxu0 }
 0x2c7   :  { %v1256_v18 = vadd.f32 %v1255_v15, %v1225_v60  ;;  %v1226_v26 = vmul.f32 %v1089_v63, %v1002_v24  ;;  %v903_v61 = vadd.f32 %v902_v43, %v2005_v45  ;;  %v1007_v0 = vmax.f32 %v911_v32, 0.0 }
 0x2c8   :  { %v1471_v27 = vpop.f32.mrf.mxu0 }
 0x2c9   :  { %v1257_v30 = vadd.f32 %v1256_v18, %v1226_v26  ;;  %v1005_v31 = vmax.f32 %v903_v61, 0.0  ;;  %v914_v63 = vadd.f32 %v1471_v27, %v2011_v48  ;;  %v2089_v48 = vpop.permute.xlu1 %1178  ;;  %v1231_v60 = vmul.f32 %v2037_v4, %v1007_v0  ;;  %v713_v61 = vpop.permute.xlu0 %712 }
 0x2ca   :  { %v905_v33 = vpop.f32.mrf.mxu0 }
 0x2cb   :  { %v1258_v35 = vadd.f32 %v1257_v30, %v1227_v42  ;;  %v906_v45 = vadd.f32 %v905_v33, %v2007_v46  ;;  %v1229_v40 = vmul.f32 %v2033_v2, %v1005_v31  ;;  %v1008_v58 = vmax.f32 %v914_v63, 0.0  ;;  %v2091_v46 = vpop.f32.mrf.mxu1 }
 0x2cc   :  { %v1474_v37 = vpop.f32.mrf.mxu0 }
 0x2cd   :  { %v1259_v38 = vadd.f32 %v1258_v35, %v1228_v34  ;;  %v1006_v14 = vmax.f32 %v906_v45, 0.0  ;;  %v927_v15 = vadd.f32 %v1474_v37, %v2017_v51  ;;  %v1232_v16 = vmul.f32 %v2039_v5, %v1008_v58  ;;  %v966_v27 = vpop.f32.mrf.mxu1  ;;  %v1184_v33 = vpop.permute.xlu1 %1183 }
 0x2ce   :  { %v918_v20 = vpop.f32.mrf.mxu0  ;;  %v718_v0 = vpop.permute.xlu0 %717  ;;  %v951_v58 = vadd.f32 %v2071_v41, %v2029_v57 }
 0x2cf   :  { %v1260_v47 = vadd.f32 %v1259_v38, %v1229_v40  ;;  %v919_v22 = vadd.f32 %v918_v20, %v2013_v49  ;;  %v1230_v1 = vmul.f32 %v2035_v3, %v1006_v14  ;;  %v1011_v30 = vmax.f32 %v927_v15, 0.0  ;;  %v1487_v63 = vpop.f32.mrf.mxu1 }
 0x2d0   :  { %v1475_v59 = vpop.f32.mrf.mxu0 }
 0x2d1   :  { %v1261_v2 = vadd.f32 %v1260_v47, %v1230_v1  ;;  %v1009_v24 = vmax.f32 %v919_v22, 0.0  ;;  %v930_v26 = vadd.f32 %v1475_v59, %v2019_v52  ;;  %v1235_v52 = vmul.f32 %v2045_v8, %v1011_v30  ;;  %v969_v47 = vpop.f32.mrf.mxu1 }
 0x2d2   :  { %v921_v43 = vpop.f32.mrf.mxu0 }
 0x2d3   :  { %v922_v18 = vadd.f32 %v921_v43, %v2015_v50  ;;  %v1262_v49 = vadd.f32 %v1261_v2, %v1231_v60  ;;  %v1233_v31 = vmul.f32 %v2041_v6, %v1009_v24  ;;  %v1012_v35 = vmax.f32 %v930_v26, 0.0  ;;  %v1490_v15 = vpop.f32.mrf.mxu1 }
 0x2d4   :  { %v1478_v3 = vpop.f32.mrf.mxu0  ;;  %v954_v60 = vadd.f32 %v953_v39, %v2055_v19  ;;  %v1017_v24 = vmax.f32 %v951_v58, 0.0  ;;  %v967_v26 = vadd.f32 %v966_v27, %v2074_v28 }
 0x2d5   :  { %v1010_v42 = vmax.f32 %v922_v18, 0.0  ;;  %v1263_v4 = vadd.f32 %v1262_v49, %v1232_v16  ;;  %v943_v37 = vadd.f32 %v1478_v3, %v2025_v55  ;;  %v1236_v14 = vmul.f32 %v2047_v9, %v1012_v35  ;;  %v723_v9 = vpop.permute.xlu0 %722  ;;  %v982_v19 = vpop.f32.mrf.mxu1 }
 0x2d6   :  { %v934_v32 = vpop.f32.mrf.mxu0  ;;  %v1018_v41 = vmax.f32 %v954_v60, 0.0  ;;  %v1241_v49 = vmul.f32 %v2061_v29, %v1017_v24 }
 0x2d7   :  { %v1234_v51 = vmul.f32 %v2043_v7, %v1010_v42  ;;  %v935_v34 = vadd.f32 %v934_v32, %v2021_v53  ;;  %v1264_v50 = vadd.f32 %v1263_v4, %v1233_v31  ;;  %v1189_v53 = vpop.permute.xlu1 %1188  ;;  %v1015_v8 = vmax.f32 %v943_v37, 0.0 }
 0x2d8   :  { %v1479_v5 = vpop.f32.mrf.mxu0  ;;  %v970_v42 = vadd.f32 %v969_v47, %v2085_v21  ;;  %v1021_v4 = vmax.f32 %v967_v26, 0.0 }
 0x2d9   :  { %v1265_v45 = vadd.f32 %v1264_v50, %v1234_v51  ;;  %v1013_v40 = vmax.f32 %v935_v34, 0.0  ;;  %v946_v7 = vadd.f32 %v1479_v5, %v2027_v56  ;;  %v959_v56 = vadd.f32 %v2063_v36, %v2059_v25  ;;  %v728_v25 = vpop.permute.xlu0 %727 }
 0x2da   :  { %v937_v38 = vpop.f32.mrf.mxu0  ;;  %v1239_v43 = vmul.f32 %v2053_v12, %v1015_v8  ;;  %v1242_v12 = vmul.f32 %v2069_v23, %v1018_v41  ;;  %v978_v51 = vadd.f32 %v1487_v63, %v718_v0  ;;  %v1022_v28 = vmax.f32 %v970_v42, 0.0 }
 0x2db   :  { %v938_v6 = vadd.f32 %v937_v38, %v2023_v54  ;;  %v1266_v20 = vadd.f32 %v1265_v45, %v1235_v52  ;;  %v1237_v1 = vmul.f32 %v2049_v10, %v1013_v40  ;;  %v1016_v2 = vmax.f32 %v946_v7, 0.0  ;;  %v1194_v57 = vpop.permute.xlu1 %1193 }
 0x2dc   :  { %v962_v10 = vadd.f32 %v2076_v44, %v2065_v13  ;;  %v1019_v39 = vmax.f32 %v959_v56, 0.0  ;;  %v1491_v13 = vpop.f32.mrf.mxu1  ;;  %v1245_v23 = vmul.f32 %v1184_v33, %v1021_v4  ;;  %v983_v5 = vadd.f32 %v982_v19, %v723_v9 }
 0x2dd   :  { %v1014_v22 = vmax.f32 %v938_v6, 0.0  ;;  %v1267_v55 = vadd.f32 %v1266_v20, %v1236_v14  ;;  %v733_v34 = vpop.permute.xlu0 %732  ;;  %v1024_v45 = vmax.f32 %v978_v51, 0.0  ;;  %v1246_v37 = vmul.f32 %v1189_v53, %v1022_v28 }
 0x2de   :  { %v1020_v36 = vmax.f32 %v962_v10, 0.0  ;;  %v1243_v44 = vmul.f32 %v2079_v62, %v1019_v39  ;;  %v985_v50 = vpop.f32.mrf.mxu1  ;;  %v1296_v9 = vlaneseq }
 0x2df   :  { %v1238_v59 = vmul.f32 %v2051_v11, %v1014_v22  ;;  %v1268_v54 = vadd.f32 %v1267_v55, %v1237_v1  ;;  %v1240_v11 = vmul.f32 %v2057_v17, %v1016_v2  ;;  %v1199_v31 = vpop.permute.xlu1 %1198  ;;  %v975_v17 = vadd.f32 %v2091_v46, %v713_v61 }
 0x2e0   :  { %v1244_v29 = vmul.f32 %v2089_v48, %v1020_v36  ;;  %v986_v40 = vadd.f32 %v985_v50, %v728_v25  ;;  %v991_v46 = vadd.f32 %v1490_v15, %v733_v34  ;;  %v1025_v61 = vmax.f32 %v983_v5, 0.0 }
 0x2e1   :  { %v1269_v18 = vadd.f32 %v1268_v54, %v1238_v59  ;;  %v1023_v35 = vmax.f32 %v975_v17, 0.0  ;;  %v738_v14 = vpop.permute.xlu0 %737  ;;  %v1248_v48 = vmul.f32 %v1199_v31, %v1024_v45  ;;  %v1297_v24 = vshrl.u32 %v1296_v9, 7 }
 0x2e2   :  { %v994_v63 = vadd.f32 %v1491_v13, %v738_v14  ;;  %v1026_v0 = vmax.f32 %v986_v40, 0.0  ;;  %v1027_v47 = vmax.f32 %v991_v46, 0.0 }
 0x2e3   :  { %v1270_v16 = vadd.f32 %v1269_v18, %v1239_v43  ;;  %v1204_v52 = vpop.permute.xlu1 %1203  ;;  %v1247_v38 = vmul.f32 %v1194_v57, %v1023_v35  ;;  %v1298_v57 = vsub.s32 0, %v1297_v24 }
 0x2e4   :  { %v1249_v22 = vmul.f32 %v1204_v52, %v1025_v61  ;;  %v1028_v58 = vmax.f32 %v994_v63, 0.0 }
 0x2e5   :  { %v1271_v3 = vadd.f32 %v1270_v16, %v1240_v11  ;;  %v1214_v55 = vpop.permute.xlu0 %1213 }
 0x2e6   :  { %v1251_v53 = vmul.f32 %v1214_v55, %v1027_v47 }
 0x2e7   :  { %v1272_v30 = vadd.f32 %v1271_v3, %v1241_v49  ;;  %v1209_v7 = vpop.permute.xlu1 %1208 }
 0x2e8   :  { %v1250_v8 = vmul.f32 %v1209_v7, %v1026_v0 }
 0x2e9   :  { %v1273_v32 = vadd.f32 %v1272_v30, %v1242_v12  ;;  %v1294_v41 = vpop.permute.xlu0 %1293 }
 0x2ea   :  { %v1299_v16 = vrot.slane %v1294_v41, %v1298_v57 }
 0x2eb   :  { %v1274_v27 = vadd.f32 %v1273_v32, %v1243_v44  ;;  %v1219_v60 = vpop.permute.xlu1 %1218 }
 0x2ec   :  { %v1252_v54 = vmul.f32 %v1219_v60, %v1028_v58 }
 0x2ed   :  { %v1275_v21 = vadd.f32 %v1274_v27, %v1244_v29 }
 0x2ef   :  { %v1276_v62 = vadd.f32 %v1275_v21, %v1245_v23 }
 0x2f1   :  { %v1277_v6 = vadd.f32 %v1276_v62, %v1246_v37 }
 0x2f3   :  { %v1278_v20 = vadd.f32 %v1277_v6, %v1247_v38 }
 0x2f5   :  { %v1279_v33 = vadd.f32 %v1278_v20, %v1248_v48 }
 0x2f7   :  { %v1280_v1 = vadd.f32 %v1279_v33, %v1249_v22 }
 0x2f9   :  { %v1281_v59 = vadd.f32 %v1280_v1, %v1250_v8 }
 0x2fb   :  { %v1282_v2 = vadd.f32 %v1281_v59, %v1251_v53 }
 0x2fd   :  { %v1283_v15 = vadd.f32 %v1282_v2, %v1252_v54 }
 0x2ff   :  { %v1284_v56 = vrot.slane %v1283_v15, 4 }
 0x301   :  { %v1285_v43 = vadd.f32 %v1284_v56, %v1283_v15 }
 0x303   :  { %v1286_v18 = vrot.slane %v1285_v43, 2 }
 0x305   :  { %v1287_v10 = vadd.f32 %v1286_v18, %v1285_v43 }
 0x307   :  { %v1288_v11 = vrot.slane %v1287_v10, 1 }
 0x309   :  { %v1289_v19 = vadd.f32 %v1288_v11, %v1287_v10 }
 0x30b   :  { %v1300_v39 = vadd.f32 %v1299_v16, %v1289_v19 }
 0x30d   :  { %v1365_v49 = vmul.f32 -1.442695, %v1300_v39 }
 0x30f   :  { %1542 = vpow2.f32 %v1365_v49 }
 0x31c   :  { %v1543_v26 = vpop.eup %1542 }
 0x31d   :  { %v1304_v3 = vadd.f32 1.0, %v1543_v26 }
 0x31f   :  { %1544 = vrcp.f32 %v1304_v3 }
 0x32c   :  { %v1545_v25 = vpop.eup %1544 }
 0x32d   :  { %v1307_v36 = vmul.f32 10.0, %v1545_v25 }
 0x32f   :  { %1308 = vst [vmem:[#allocation3] sm:$0x1] %v1307_v36 }
 0x330   :  { %1557 = shalt.err (!%p1554_p4)
}
 0x331   :  { %1318 = dma.vmem_to_hbm [thread:$0]  %s1316_s12, 16, %s2136_s9, [#allocation4]  }
 0x332   :  { %1566 = dma.done.wait [#allocation4], 16  }
 0x333   :  { %1567 = vsyncadd [#allocation4], 4294967280 }
 0x334   :  { %1322 = vsyncpa [#allocation4], 1 }

</bundles_post_ra>
